<compile_context>
chip_gen: v5e
topology: v5e:2x2
jax: 0.10.0
libtpu: 0.0.40
codegen_flags: <defaults>
</compile_context>

<pallas_src>
import math

import jax
import jax.numpy as jnp
from jax.experimental import pallas as pl
from jax.experimental.pallas import tpu as pltpu


def _text_encoder_kernel(ids_ref, lens_ref, emb_ref, out_ref):
    """One grid step == TB batch rows.

    ids_ref  : VMEM (TB, L) int32 token ids
    lens_ref : VMEM (TB, 1) int32 valid lengths
    emb_ref  : VMEM (V, D)  embedding table (f32 or bf16)
    out_ref  : VMEM (TB, D) f32 mean-pooled embeddings
    """
    TB, L = ids_ref.shape
    V = emb_ref.shape[0]

    ids = ids_ref[...]      # (TB, L) int32
    lens = lens_ref[...]    # (TB, 1) int32

    iota_v = jax.lax.broadcasted_iota(jnp.int32, (TB, V), 1)

    # Per-row token counts with the length mask folded in.  L is small and
    # static, so this unrolls into L (TB, V) compare+add VPU ops (no (L, D)
    # elementwise mask multiply and no post-matmul reduction needed).
    counts = jnp.zeros((TB, V), dtype=jnp.float32)
    for l in range(L):
        hit = (ids[:, l:l + 1] == iota_v) & (lens > l)   # (TB, V) bool
        counts = counts + hit.astype(jnp.float32)

    # Fold the mean-over-L scaling into the small (TB, V) operand.  This
    # matches torch.mean(dim=1): divide by L (text_max_len), not by text_lens.
    counts = counts * jnp.float32(1.0 / L)

    # Single MXU matmul per step: (TB, V) @ (V, D) -> (TB, D).
    out_ref[...] = jnp.dot(
        counts.astype(emb_ref.dtype), emb_ref[...],
        preferred_element_type=jnp.float32,
    ).astype(out_ref.dtype)


def _round_up(x, m):
    return (x + m - 1) // m * m


def text_encoder_forward(text_vecs, text_lens, emb_weight, *,
                         block_b=256, table_dtype=None):
    """text_vecs: (B, L) int; text_lens: (B,) int; emb_weight: (V, D) f32.

    Returns (B, D) f32: mean over L of the length-masked embeddings
    (TextEncoder.forward semantics).
    """
    B, L = text_vecs.shape
    V, D = emb_weight.shape

    if table_dtype is not None:
        emb_weight = emb_weight.astype(table_dtype)

    # Batch tile: multiple of 8 sublanes, capped at block_b (256 fills the
    # v6e/v7x MXU M dimension; on v5e any multiple of 128 is already full).
    b8 = _round_up(B, 8)
    TB = min(block_b, b8)
    B_pad = _round_up(b8, TB)

    ids = text_vecs.astype(jnp.int32)
    lens = text_lens.astype(jnp.int32)
    if B_pad != B:
        ids = jnp.pad(ids, ((0, B_pad - B), (0, 0)))
        lens = jnp.pad(lens, (0, B_pad - B))   # padded rows: len 0 -> zero output
    lens2d = lens.reshape(B_pad, 1)

    grid = (B_pad // TB,)

    # Explicit VMEM budget: double-buffered table + per-step id/len/out tiles.
    itemsize = jnp.dtype(emb_weight.dtype).itemsize
    need = (2 * V * D * itemsize
            + 2 * (TB * L * 4 + TB * 4 + TB * D * 4)
            + (1 << 20))
    vmem_limit = int(max(32 * 1024 * 1024, need))

    out = pl.pallas_call(
        _text_encoder_kernel,
        out_shape=jax.ShapeDtypeStruct((B_pad, D), jnp.float32),
        grid_spec=pl.GridSpec(
            grid=grid,
            in_specs=[
                pl.BlockSpec((TB, L), lambda i: (i, 0)),   # ids tile
                pl.BlockSpec((TB, 1), lambda i: (i, 0)),   # lens tile
                pl.BlockSpec((V, D), lambda i: (0, 0)),    # full table (resident)
            ],
            out_specs=pl.BlockSpec((TB, D), lambda i: (i, 0)),
        ),
        compiler_params=pltpu.CompilerParams(
            dimension_semantics=("parallel",),   # batch tiles shard across TCs
            vmem_limit_bytes=vmem_limit,
        ),
    )(ids, lens2d, emb_weight)

    return out[:B]


def _reference_forward(text_vecs, text_lens, emb_weight):
    """Pure-JAX reference mirroring the PyTorch module (f32 throughout)."""
    B, L = text_vecs.shape
    embeds = emb_weight[text_vecs]                              # (B, L, D)
    mask = jnp.arange(L)[None, :] < text_lens[:, None]          # (B, L)
    embeds = embeds * mask[..., None].astype(embeds.dtype)
    return jnp.mean(embeds, axis=1)                             # (B, D)


if __name__ == "__main__":
    # Small, module-consistent shapes.
    B = 2          # batch_size
    L = 8          # text_max_len
    V = 32         # num_word
    D = 32         # embed_dim

    key = jax.random.PRNGKey(0)
    k_emb, k_ids, k_len = jax.random.split(key, 3)

    # kaiming_uniform_ (default a=0): bound = sqrt(2) * sqrt(3 / fan_in), fan_in = D.
    bound = math.sqrt(2.0) * math.sqrt(3.0 / D)
    emb_weight = jax.random.uniform(
        k_emb, (V, D), minval=-bound, maxval=bound, dtype=jnp.float32)

    text_vecs = jax.random.randint(k_ids, (B, L), 0, V, dtype=jnp.int32)
    text_lens = jax.random.randint(k_len, (B,), 1, L + 1, dtype=jnp.int32)

    # f32 table: exact module semantics.
    out_f32 = jax.block_until_ready(
        text_encoder_forward(text_vecs, text_lens, emb_weight,
                             table_dtype=jnp.float32))
    ref_f32 = _reference_forward(text_vecs, text_lens, emb_weight)
    assert out_f32.shape == (B, D)
    assert jnp.allclose(out_f32, ref_f32, atol=1e-5, rtol=1e-5), "f32 mismatch"

    # bf16 table (perf path): compare against a bf16-table reference.
    out_bf16 = jax.block_until_ready(
        text_encoder_forward(text_vecs, text_lens, emb_weight,
                             table_dtype=jnp.bfloat16))
    ref_bf16 = _reference_forward(
        text_vecs, text_lens,
        emb_weight.astype(jnp.bfloat16).astype(jnp.float32))
    assert jnp.allclose(out_bf16, ref_bf16, atol=1e-3, rtol=1e-3), "bf16 mismatch"

    print("KERNEL_OK")
</pallas_src>

<mosaic_0001>
module attributes {stable_mosaic.version = 11 : i64} {
  func.func @_text_encoder_kernel(%arg0: i32, %arg1: memref<8x8xi32, #tpu.memory_space<vmem>>, %arg2: memref<8x1xi32, #tpu.memory_space<vmem>>, %arg3: memref<32x32xf32, #tpu.memory_space<vmem>>, %arg4: memref<8x32xf32, #tpu.memory_space<vmem>>) attributes {dimension_semantics = [#tpu.dimension_semantics<parallel>], iteration_bounds = array<i64: 1>, scalar_prefetch = 0 : i64, scratch_operands = 0 : i64, tpu.core_type = #tpu.core_type<tc>, window_params = [{transform_indices = @transform_0, window_bounds = array<i64: 8, 8>}, {transform_indices = @transform_1, window_bounds = array<i64: 8, 1>}, {pipeline_mode = #tpu.pipeline_mode<synchronous>, transform_indices = @transform_2, window_bounds = array<i64: 32, 32>}, {transform_indices = @transform_3, window_bounds = array<i64: 8, 32>}]} {
    %c0 = arith.constant 0 : index
    %c0_0 = arith.constant 0 : index
    %0 = vector.load %arg1[%c0, %c0_0] : memref<8x8xi32, #tpu.memory_space<vmem>>, vector<8x8xi32>
    %c0_1 = arith.constant 0 : index
    %c0_2 = arith.constant 0 : index
    %1 = vector.load %arg2[%c0_1, %c0_2] : memref<8x1xi32, #tpu.memory_space<vmem>>, vector<8x1xi32>
    %2 = tpu.iota {dimensions = array<i32: 1>} : vector<8x32xi32>
    %cst = arith.constant 0.000000e+00 : f32
    %3 = vector.broadcast %cst : f32 to vector<8x32xf32>
    %4 = vector.extract_strided_slice %0 {offsets = [0, 0], sizes = [8, 1], strides = [1, 1]} : vector<8x8xi32> to vector<8x1xi32>
    %5 = vector.broadcast %4 : vector<8x1xi32> to vector<8x32xi32>
    %6 = arith.cmpi eq, %5, %2 : vector<8x32xi32>
    %c0_i32 = arith.constant 0 : i32
    %7 = vector.broadcast %c0_i32 : i32 to vector<8x1xi32>
    %8 = arith.cmpi sgt, %1, %7 : vector<8x1xi32>
    %9 = vector.broadcast %8 : vector<8x1xi1> to vector<8x32xi1>
    %10 = arith.andi %6, %9 : vector<8x32xi1>
    %11 = arith.extui %10 : vector<8x32xi1> to vector<8x32xi32>
    %12 = arith.sitofp %11 : vector<8x32xi32> to vector<8x32xf32>
    %13 = arith.addf %3, %12 : vector<8x32xf32>
    %14 = vector.extract_strided_slice %0 {offsets = [0, 1], sizes = [8, 1], strides = [1, 1]} : vector<8x8xi32> to vector<8x1xi32>
    %15 = vector.broadcast %14 : vector<8x1xi32> to vector<8x32xi32>
    %16 = arith.cmpi eq, %15, %2 : vector<8x32xi32>
    %c1_i32 = arith.constant 1 : i32
    %17 = vector.broadcast %c1_i32 : i32 to vector<8x1xi32>
    %18 = arith.cmpi sgt, %1, %17 : vector<8x1xi32>
    %19 = vector.broadcast %18 : vector<8x1xi1> to vector<8x32xi1>
    %20 = arith.andi %16, %19 : vector<8x32xi1>
    %21 = arith.extui %20 : vector<8x32xi1> to vector<8x32xi32>
    %22 = arith.sitofp %21 : vector<8x32xi32> to vector<8x32xf32>
    %23 = arith.addf %13, %22 : vector<8x32xf32>
    %24 = vector.extract_strided_slice %0 {offsets = [0, 2], sizes = [8, 1], strides = [1, 1]} : vector<8x8xi32> to vector<8x1xi32>
    %25 = vector.broadcast %24 : vector<8x1xi32> to vector<8x32xi32>
    %26 = arith.cmpi eq, %25, %2 : vector<8x32xi32>
    %c2_i32 = arith.constant 2 : i32
    %27 = vector.broadcast %c2_i32 : i32 to vector<8x1xi32>
    %28 = arith.cmpi sgt, %1, %27 : vector<8x1xi32>
    %29 = vector.broadcast %28 : vector<8x1xi1> to vector<8x32xi1>
    %30 = arith.andi %26, %29 : vector<8x32xi1>
    %31 = arith.extui %30 : vector<8x32xi1> to vector<8x32xi32>
    %32 = arith.sitofp %31 : vector<8x32xi32> to vector<8x32xf32>
    %33 = arith.addf %23, %32 : vector<8x32xf32>
    %34 = vector.extract_strided_slice %0 {offsets = [0, 3], sizes = [8, 1], strides = [1, 1]} : vector<8x8xi32> to vector<8x1xi32>
    %35 = vector.broadcast %34 : vector<8x1xi32> to vector<8x32xi32>
    %36 = arith.cmpi eq, %35, %2 : vector<8x32xi32>
    %c3_i32 = arith.constant 3 : i32
    %37 = vector.broadcast %c3_i32 : i32 to vector<8x1xi32>
    %38 = arith.cmpi sgt, %1, %37 : vector<8x1xi32>
    %39 = vector.broadcast %38 : vector<8x1xi1> to vector<8x32xi1>
    %40 = arith.andi %36, %39 : vector<8x32xi1>
    %41 = arith.extui %40 : vector<8x32xi1> to vector<8x32xi32>
    %42 = arith.sitofp %41 : vector<8x32xi32> to vector<8x32xf32>
    %43 = arith.addf %33, %42 : vector<8x32xf32>
    %44 = vector.extract_strided_slice %0 {offsets = [0, 4], sizes = [8, 1], strides = [1, 1]} : vector<8x8xi32> to vector<8x1xi32>
    %45 = vector.broadcast %44 : vector<8x1xi32> to vector<8x32xi32>
    %46 = arith.cmpi eq, %45, %2 : vector<8x32xi32>
    %c4_i32 = arith.constant 4 : i32
    %47 = vector.broadcast %c4_i32 : i32 to vector<8x1xi32>
    %48 = arith.cmpi sgt, %1, %47 : vector<8x1xi32>
    %49 = vector.broadcast %48 : vector<8x1xi1> to vector<8x32xi1>
    %50 = arith.andi %46, %49 : vector<8x32xi1>
    %51 = arith.extui %50 : vector<8x32xi1> to vector<8x32xi32>
    %52 = arith.sitofp %51 : vector<8x32xi32> to vector<8x32xf32>
    %53 = arith.addf %43, %52 : vector<8x32xf32>
    %54 = vector.extract_strided_slice %0 {offsets = [0, 5], sizes = [8, 1], strides = [1, 1]} : vector<8x8xi32> to vector<8x1xi32>
    %55 = vector.broadcast %54 : vector<8x1xi32> to vector<8x32xi32>
    %56 = arith.cmpi eq, %55, %2 : vector<8x32xi32>
    %c5_i32 = arith.constant 5 : i32
    %57 = vector.broadcast %c5_i32 : i32 to vector<8x1xi32>
    %58 = arith.cmpi sgt, %1, %57 : vector<8x1xi32>
    %59 = vector.broadcast %58 : vector<8x1xi1> to vector<8x32xi1>
    %60 = arith.andi %56, %59 : vector<8x32xi1>
    %61 = arith.extui %60 : vector<8x32xi1> to vector<8x32xi32>
    %62 = arith.sitofp %61 : vector<8x32xi32> to vector<8x32xf32>
    %63 = arith.addf %53, %62 : vector<8x32xf32>
    %64 = vector.extract_strided_slice %0 {offsets = [0, 6], sizes = [8, 1], strides = [1, 1]} : vector<8x8xi32> to vector<8x1xi32>
    %65 = vector.broadcast %64 : vector<8x1xi32> to vector<8x32xi32>
    %66 = arith.cmpi eq, %65, %2 : vector<8x32xi32>
    %c6_i32 = arith.constant 6 : i32
    %67 = vector.broadcast %c6_i32 : i32 to vector<8x1xi32>
    %68 = arith.cmpi sgt, %1, %67 : vector<8x1xi32>
    %69 = vector.broadcast %68 : vector<8x1xi1> to vector<8x32xi1>
    %70 = arith.andi %66, %69 : vector<8x32xi1>
    %71 = arith.extui %70 : vector<8x32xi1> to vector<8x32xi32>
    %72 = arith.sitofp %71 : vector<8x32xi32> to vector<8x32xf32>
    %73 = arith.addf %63, %72 : vector<8x32xf32>
    %74 = vector.extract_strided_slice %0 {offsets = [0, 7], sizes = [8, 1], strides = [1, 1]} : vector<8x8xi32> to vector<8x1xi32>
    %75 = vector.broadcast %74 : vector<8x1xi32> to vector<8x32xi32>
    %76 = arith.cmpi eq, %75, %2 : vector<8x32xi32>
    %c7_i32 = arith.constant 7 : i32
    %77 = vector.broadcast %c7_i32 : i32 to vector<8x1xi32>
    %78 = arith.cmpi sgt, %1, %77 : vector<8x1xi32>
    %79 = vector.broadcast %78 : vector<8x1xi1> to vector<8x32xi1>
    %80 = arith.andi %76, %79 : vector<8x32xi1>
    %81 = arith.extui %80 : vector<8x32xi1> to vector<8x32xi32>
    %82 = arith.sitofp %81 : vector<8x32xi32> to vector<8x32xf32>
    %83 = arith.addf %73, %82 : vector<8x32xf32>
    %cst_3 = arith.constant 1.250000e-01 : f32
    %84 = vector.broadcast %cst_3 : f32 to vector<8x32xf32>
    %85 = arith.mulf %83, %84 : vector<8x32xf32>
    %c0_4 = arith.constant 0 : index
    %c0_5 = arith.constant 0 : index
    %86 = vector.load %arg3[%c0_4, %c0_5] : memref<32x32xf32, #tpu.memory_space<vmem>>, vector<32x32xf32>
    %cst_6 = arith.constant dense<0.000000e+00> : vector<8x32xf32>
    %87 = tpu.matmul %85, %86, %cst_6 {dimension_numbers = #tpu.dot_dimension_numbers<[1], [0], [0], [1], [0, 0, 1, 1], [], []>} : vector<8x32xf32>, vector<32x32xf32>, vector<8x32xf32> -> vector<8x32xf32>
    %c0_7 = arith.constant 0 : index
    %c0_8 = arith.constant 0 : index
    %88 = vector.load %arg4[%c0_7, %c0_8] : memref<8x32xf32, #tpu.memory_space<vmem>>, vector<8x32xf32>
    tpu.vector_store %arg4[%c0_7, %c0_8], %87 {strides = array<i32>} : memref<8x32xf32, #tpu.memory_space<vmem>>, vector<8x32xf32>,
    return
  }
  func.func @transform_0(%arg0: i32) -> (i32, i32) {
    %c0_i32 = arith.constant 0 : i32
    %c0_i32_0 = arith.constant 0 : i32
    return %arg0, %c0_i32 : i32, i32
  }
  func.func @transform_1(%arg0: i32) -> (i32, i32) {
    %c0_i32 = arith.constant 0 : i32
    %c0_i32_0 = arith.constant 0 : i32
    return %arg0, %c0_i32 : i32, i32
  }
  func.func @transform_2(%arg0: i32) -> (i32, i32) {
    %c0_i32 = arith.constant 0 : i32
    %c0_i32_0 = arith.constant 0 : i32
    %c0_i32_1 = arith.constant 0 : i32
    return %c0_i32, %c0_i32_0 : i32, i32
  }
  func.func @transform_3(%arg0: i32) -> (i32, i32) {
    %c0_i32 = arith.constant 0 : i32
    %c0_i32_0 = arith.constant 0 : i32
    return %arg0, %c0_i32 : i32, i32
  }
}

</mosaic_0001>

<bundles_post_ra>
// kernel: tpu_custom_call.1
= control target key start
LH: loop header
LB: loop body
LE: loop exit
PB: predicated region body
PF: predicated region fallthrough
CT: control target
= control target key end

     0   :  { %8 = vsyncpa [#allocation3], 0  ;;  %s324_s0 = inlined_call_operand.vmem [shape: s32[8,8], index: 0, kind: input, shape index: {}]   ;;  %s325_s1 = inlined_call_operand.vmem [shape: s32[8,1], index: 1, kind: input, shape index: {}]   ;;  %s326_s2 = inlined_call_operand.hbm [shape: f32[32,32], index: 2, kind: input, shape index: {}]   ;;  %s327_s3 = inlined_call_operand.hbm [shape: f32[8,32], index: 3, kind: output, shape index: {}]  }
   0x1   :  { %9 = vsyncpa [#allocation4], 0  ;;  %s18_s14 = sshll.u32 %s326_s2, 4  ;;  %s279_s15 = smov [#allocation2]   ;;  %s19_s14 = int_to_ptr.hbm [resolvable:$true] %s18_s14 }
   0x2   :  { %s20_s16 = sshll.u32 %s279_s15, 4  ;;  %s280_s17 = smov 128   ;;  %s21_s16 = int_to_ptr.vmem [resolvable:$true] %s20_s16 }
   0x3   :  { %s281_s18 = smov 8  }
   0x4   :  { %26 = dma.hbm_to_vmem [thread:$0]  %s19_s14, 512, %s21_s16, [#allocation3], %s280_s17, %s280_s17, %s281_s18  }
   0x5   :  { %275 = dma.done.wait [#allocation3], 512  }
   0x6   :  { %276 = vsyncadd [#allocation3], 4294966784  ;;  %v282_v0 = vmov 3   ;;  %v283_v1 = vmov 1   ;;  %v284_v2 = vmov 2   ;;  %v31_v3 = vld [vmem:[%s324_s0] sm:$0xff]  ;;  %v33_v26 = vlaneseq }
   0x7   :  { %218 = vset.pattern.permute.xlu0 %v282_v0  ;;  %216 = vset.pattern.permute.xlu1 %v283_v1  ;;  %v32_v4 = vld [vmem:[%s325_s1] sm:$0xff]  ;;  %v285_v5 = vmov 0   ;;  %v286_v10 = vmov 4   ;;  %v287_v13 = vmov 5   ;;  %v288_v14 = vmov 6   ;;  %v151_v25 = vld [vmem:[#allocation2 + $0x18] sm:$0xff] }
   0x8   :  { %217 = vset.pattern.permute.xlu2 %v284_v2  ;;  %78 = vperm.xlu0 %218, %v31_v3   ;;  %vm53_vm0 = vcmp.gt.s32.totalorder %v32_v4, 1  ;;  %vm67_vm1 = vcmp.gt.s32.totalorder %v32_v4, 2  ;;  %vm39_vm2 = vcmp.gt.s32.totalorder %v32_v4, 0  ;;  %vm81_vm3 = vcmp.gt.s32.totalorder %v32_v4, 3  ;;  %v150_v27 = vld [vmem:[#allocation2 + $0x10] sm:$0xff]  ;;  %v149_v28 = vld [vmem:[#allocation2 + $0x8] sm:$0xff] }
   0x9   :  { %50 = vperm.xlu1 %216, %v31_v3   ;;  %64 = vperm.xlu2 %217, %v31_v3   ;;  %v54_v6 = vsel %vm53_vm0, 1, %v285_v5  ;;  %v68_v7 = vsel %vm67_vm1, 1, %v285_v5  ;;  %v40_v8 = vsel %vm39_vm2, 1, %v285_v5  ;;  %v82_v9 = vsel %vm81_vm3, 1, %v285_v5  ;;  %v148_v29 = vld [vmem:[#allocation2] sm:$0xff]  ;;  %s291_s0 = smov [#allocation5]  }
   0xa   :  { %vm109_vm4 = vcmp.gt.s32.totalorder %v32_v4, 5  ;;  %vm95_vm5 = vcmp.gt.s32.totalorder %v32_v4, 4  ;;  %vm123_vm6 = vcmp.gt.s32.totalorder %v32_v4, 6  ;;  %vm137_vm7 = vcmp.gt.s32.totalorder %v32_v4, 7  ;;  %168 = vmatpush.msra.mxu0 %v151_v25  ;;  %s182_s1 = sshll.u32 %s291_s0, 4  ;;  %s184_s24 = sshll.u32 %s327_s3, 4  ;;  %s183_s1 = int_to_ptr.vmem [resolvable:$true] %s182_s1  ;;  %s185_s24 = int_to_ptr.hbm [resolvable:$true] %s184_s24 }
   0xb   :  { %v110_v11 = vsel %vm109_vm4, 1, %v285_v5  ;;  %v96_v12 = vsel %vm95_vm5, 1, %v285_v5  ;;  %v124_v15 = vsel %vm123_vm6, 1, %v285_v5  ;;  %v289_v16 = vmov 7  }
   0xc   :  { %v138_v17 = vsel %vm137_vm7, 1, %v285_v5  ;;  %169 = vmatpush.msra.mxu0 %v150_v27  ;;  %v34_v32 = vand.u32 127, %v33_v26  ;;  %v290_v35 = vmov 0.0  }
   0xe   :  { %170 = vmatpush.msra.mxu0 %v149_v28 }
  0x10   :  { %219 = vset.pattern.permute.xlu0 %v285_v5  ;;  %171 = vmatpush.msra.mxu0 %v148_v29 }
  0x11   :  { %220 = vset.pattern.permute.xlu1 %v285_v5  ;;  %36 = vperm.xlu0 %219, %v31_v3  }
  0x12   :  { %56 = vperm.xlu1 %220, %v54_v6   ;;  %221 = vset.pattern.permute.xlu2 %v285_v5 }
  0x13   :  { %70 = vperm.xlu2 %221, %v68_v7  }
  0x19   :  { %42 = vperm.xlu0 %219, %v40_v8  }
  0x1a   :  { %84 = vperm.xlu1 %220, %v82_v9  }
  0x1b   :  { %222 = vset.pattern.permute.xlu2 %v286_v10 }
  0x1c   :  { %92 = vperm.xlu2 %222, %v31_v3  }
  0x21   :  { %112 = vperm.xlu0 %219, %v110_v11  }
  0x22   :  { %98 = vperm.xlu1 %220, %v96_v12  }
  0x24   :  { %223 = vset.pattern.permute.xlu2 %v287_v13 }
  0x25   :  { %106 = vperm.xlu2 %223, %v31_v3  }
  0x2a   :  { %224 = vset.pattern.permute.xlu1 %v288_v14 }
  0x2b   :  { %120 = vperm.xlu1 %224, %v31_v3  }
  0x2d   :  { %225 = vset.pattern.permute.xlu2 %v285_v5 }
  0x2e   :  { %126 = vperm.xlu2 %225, %v124_v15  }
  0x33   :  { %226 = vset.pattern.permute.xlu1 %v289_v16 }
  0x34   :  { %134 = vperm.xlu1 %226, %v31_v3  }
  0x36   :  { %140 = vperm.xlu2 %225, %v138_v17  }
  0x63   :  { %v65_v18 = vpop.permute.xlu2 %64 }
  0x64   :  { %vm66_vm14 = vcmp.eq.s32.totalorder %v65_v18, %v34_v32 }
  0x6d   :  { %v71_v21 = vpop.permute.xlu2 %70 }
  0x6e   :  { %vm72_vm15 = vcmp.eq.s32.totalorder %v71_v21, 1 }
  0x6f   :  { %vm73_vm0 = vmand %vm66_vm14, %vm72_vm15 }
  0x70   :  { %v196_v40 = vsel %vm73_vm0, 1.0, %v290_v35  ;;  %vm152_vm0 = vcmask 261120  }
  0x76   :  { %v93_v24 = vpop.permute.xlu2 %92 }
  0x77   :  { %vm94_vm4 = vcmp.eq.s32.totalorder %v93_v24, %v34_v32 }
  0x7a   :  { %v79_v20 = vpop.permute.xlu0 %78 }
  0x7b   :  { %v51_v19 = vpop.permute.xlu1 %50  ;;  %vm80_vm3 = vcmp.eq.s32.totalorder %v79_v20, %v34_v32 }
  0x7c   :  { %vm52_vm12 = vcmp.eq.s32.totalorder %v51_v19, %v34_v32 }
  0x7f   :  { %v107_v33 = vpop.permute.xlu2 %106 }
  0x80   :  { %vm108_vm7 = vcmp.eq.s32.totalorder %v107_v33, %v34_v32 }
  0x83   :  { %v37_v22 = vpop.permute.xlu0 %36 }
  0x84   :  { %v57_v23 = vpop.permute.xlu1 %56  ;;  %vm38_vm8 = vcmp.eq.s32.totalorder %v37_v22, %v34_v32 }
  0x85   :  { %vm58_vm10 = vcmp.eq.s32.totalorder %v57_v23, 1 }
  0x86   :  { %vm59_vm13 = vmand %vm52_vm12, %vm58_vm10 }
  0x87   :  { %v195_v37 = vsel %vm59_vm13, 1.0, %v290_v35 }
  0x88   :  { %v127_v39 = vpop.permute.xlu2 %126 }
  0x8b   :  { %v43_v30 = vpop.permute.xlu0 %42 }
  0x8c   :  { %v85_v31 = vpop.permute.xlu1 %84  ;;  %vm44_vm9 = vcmp.eq.s32.totalorder %v43_v30, 1 }
  0x8d   :  { %vm45_vm11 = vmand %vm38_vm8, %vm44_vm9  ;;  %vm86_vm1 = vcmp.eq.s32.totalorder %v85_v31, 1  ;;  %vm128_vm9 = vcmp.eq.s32.totalorder %v127_v39, 1 }
  0x8e   :  { %v194_v36 = vsel %vm45_vm11, 1.0, %v290_v35  ;;  %vm87_vm5 = vmand %vm80_vm3, %vm86_vm1 }
  0x8f   :  { %v62_v38 = vadd.f32 %v195_v37, %v194_v36  ;;  %v197_v44 = vsel %vm87_vm5, 1.0, %v290_v35 }
  0x90   :  { %v141_v48 = vpop.permute.xlu2 %140 }
  0x91   :  { %v76_v42 = vadd.f32 %v196_v40, %v62_v38  ;;  %vm142_vm13 = vcmp.eq.s32.totalorder %v141_v48, 1 }
  0x93   :  { %v113_v41 = vpop.permute.xlu0 %112  ;;  %v90_v46 = vadd.f32 %v197_v44, %v76_v42 }
  0x94   :  { %v99_v34 = vpop.permute.xlu1 %98  ;;  %vm114_vm8 = vcmp.eq.s32.totalorder %v113_v41, 1 }
  0x95   :  { %vm100_vm2 = vcmp.eq.s32.totalorder %v99_v34, 1  ;;  %vm115_vm11 = vmand %vm108_vm7, %vm114_vm8 }
  0x96   :  { %vm101_vm6 = vmand %vm94_vm4, %vm100_vm2  ;;  %v199_v49 = vsel %vm115_vm11, 1.0, %v290_v35 }
  0x97   :  { %v198_v45 = vsel %vm101_vm6, 1.0, %v290_v35 }
  0x98   :  { %v104_v47 = vadd.f32 %v198_v45, %v90_v46 }
  0x9a   :  { %v118_v51 = vadd.f32 %v199_v49, %v104_v47 }
  0x9d   :  { %v121_v43 = vpop.permute.xlu1 %120 }
  0x9e   :  { %vm122_vm10 = vcmp.eq.s32.totalorder %v121_v43, %v34_v32 }
  0x9f   :  { %vm129_vm12 = vmand %vm122_vm10, %vm128_vm9 }
  0xa0   :  { %v200_v50 = vsel %vm129_vm12, 1.0, %v290_v35 }
  0xa1   :  { %v132_v53 = vadd.f32 %v200_v50, %v118_v51 }
  0xa6   :  { %v135_v52 = vpop.permute.xlu1 %134 }
  0xa7   :  { %vm136_vm14 = vcmp.eq.s32.totalorder %v135_v52, %v34_v32 }
  0xa8   :  { %vm143_vm15 = vmand %vm136_vm14, %vm142_vm13 }
  0xa9   :  { %v201_v54 = vsel %vm143_vm15, 1.0, %v290_v35 }
  0xaa   :  { %v146_v55 = vadd.f32 %v201_v54, %v132_v53 }
  0xac   :  { %v147_v56 = vmul.f32 0.125, %v146_v55 }
  0xae   :  { %202 = vmatmul.msk.f32.vlgmr.msra.gmra.mxu0 %vm152_vm0, %v147_v56 }
 0x12b   :  { %v173_v57 = vpop.f32.mrf.mxu0 }
 0x12c   :  { %176 = vst.msk [vmem:[#allocation5] sm:$0xff] %vm152_vm0, %v173_v57 }
 0x12d   :  { %187 = dma.vmem_to_hbm [thread:$0]  %s183_s1, 128, %s185_s24, [#allocation4]  }
 0x12e   :  { %277 = dma.done.wait [#allocation4], 128  }
 0x12f   :  { %278 = vsyncadd [#allocation4], 4294967168 }
 0x130   :  { %192 = vsyncpa [#allocation3], 1 }
 0x131   :  { %193 = vsyncpa [#allocation4], 1 }

</bundles_post_ra>
